<compile_context>
chip_gen: v5e
topology: v5e:2x2
jax: 0.10.0
libtpu: 0.0.40
codegen_flags: <defaults>
</compile_context>

<pallas_src>
import functools

import jax
import jax.numpy as jnp
from jax.experimental import pallas as pl
from jax.experimental.pallas import tpu as pltpu


def _patch_conv_kernel(x_ref, w_ref, b_ref, o_ref, *, p, Wp, pC, folded, cast_dtype):
    """One grid step = `tb` rows of the patch grid.

    folded (C_out < 128, lane-dense output):
      x_ref: (tb, p, Wp*pC)        natural NHWC rows, no transpose
      w_ref: (p, Wp*pC, Wp*C_out)  block-diagonal weight
      b_ref: (1, Wp*C_out)
      o_ref: (tb, Wp*C_out)        full lane-dense output rows
    standard (C_out >= 128, natural layout already lane-dense):
      x_ref: (tb, p, Wp, pC)
      w_ref: (p, pC, C_out)
      b_ref: (1, C_out)
      o_ref: (tb*Wp, C_out)        NHWC memory order, stored with no reshape
    """
    tb = x_ref.shape[0]
    acc = None
    for kh in range(p):  # p is small (2..7); unrolled
        if folded:
            a = x_ref[:, kh, :]                              # (tb, Wp*pC), no reshape
        else:
            # Free vreg regroup when Wp % 8 == 0 (all shapes exercised here).
            a = x_ref[:, kh, :, :].reshape(tb * Wp, pC)
        if cast_dtype is not None and a.dtype != cast_dtype:
            a = a.astype(cast_dtype)                          # in-VMEM cast, no HBM pass
        d = jnp.dot(a, w_ref[kh], preferred_element_type=jnp.float32)
        acc = d if acc is None else acc + d                   # init from kh=0 dot
    acc = acc + b_ref[...].astype(jnp.float32)                # bias added once
    o_ref[...] = acc.astype(o_ref.dtype)                      # no output-side reshape


def _vmem_block_bytes(shape, dtype):
    """Conservative VMEM footprint of one block ((8,128) tiling on the minor dims)."""
    lead = 1
    for d in shape[:-2]:
        lead *= int(d)
    sub = -(-int(shape[-2]) // 8) * 8
    lane = -(-int(shape[-1]) // 128) * 128
    return lead * sub * lane * jnp.dtype(dtype).itemsize


def _vmem_budget():
    """(per-input-buffer cap, vmem_limit_bytes, physical VMEM) for this generation."""
    try:
        phys = int(pltpu.get_tpu_info().vmem_capacity_bytes)
    except Exception:
        phys = 64 * 1024 * 1024                     # assume the tightest budget (v7x)
    if phys >= 96 * 1024 * 1024:                    # v5e / v6e: 128 MiB physical VMEM
        return 14 * 1024 * 1024, 64 * 1024 * 1024, phys
    return 7 * 1024 * 1024, 44 * 1024 * 1024, phys  # v7x: 64 MiB physical per TC


def _pick_tb(R, Wp, bytes_per_row, per_buf_cap, row_target=4096):
    """Rows of the patch grid per grid step."""
    if R <= 8:
        return R
    tb = max(1, row_target // max(Wp, 1))                     # ~4096 matmul rows / step
    tb = min(tb, max(1, per_buf_cap // max(bytes_per_row, 1)))
    if R >= 32:
        tb = min(tb, R // 4)                                  # >= 4 steps (2 per TC on v7x)
    tb = max(8, (tb // 8) * 8)                                # sublane-aligned 2-D out blocks
    return min(tb, R)


def downsample2d(x, weight, bias, patch_size, *, compute_dtype=None):
    """Pallas forward of timm Downsample2d.

    x: (B, H, W, C_in) NHWC; weight: (C_out, C_in, p, p) (torch Conv2d layout);
    bias: (C_out,).  Returns (B, H//p, W//p, C_out) NHWC.
    """
    B, H, W, C = x.shape
    C_out = int(weight.shape[0])
    p = int(patch_size)
    Hp, Wp = H // p, W // p
    pC = p * C
    n = C_out
    out_dtype = x.dtype
    R = B * Hp                                    # rows of the patch grid

    # Conv2d with stride == kernel floors any remainder rows/cols.
    # (The crop is an extra HBM pass only in this non-divisible corner case.)
    if H != Hp * p or W != Wp * p:
        x = x[:, :Hp * p, :Wp * p, :]

    # Tiny one-off weight reorder: (C_out, C_in, p, p) -> (kh, kw*C + c, C_out),
    # matching the (kw, c) order of the flattened activation rows.
    w2 = weight.transpose(2, 3, 1, 0).reshape(p, pC, n)
    b2 = bias.reshape(1, n)
    if compute_dtype is not None:
        w2 = w2.astype(compute_dtype)             # tiny; activation cast happens in-kernel

    per_buf_cap, vmem_limit, vmem_phys = _vmem_budget()
    act_dtype = x.dtype

    # Lane-dense output path for small C_out: fold (Wp, C_out) into the lane dim via a
    # block-diagonal weight so the kernel needs no reshape anywhere.
    w_bd_bytes = p * (Wp * pC) * (Wp * n) * jnp.dtype(w2.dtype).itemsize
    folded = (n < 128) and (Wp > 1) and (w_bd_bytes <= 2 * 1024 * 1024)

    if folded:
        xr = x.reshape(R, p, Wp * pC)             # FREE row-major view
        eye = jnp.eye(Wp, dtype=w2.dtype)
        w_k = jnp.einsum("wz,pkn->pwkzn", eye, w2).reshape(p, Wp * pC, Wp * n)
        b_k = jnp.tile(b2, (1, Wp))               # (1, Wp*C_out)
        in_row_bytes = _vmem_block_bytes((1, p, Wp * pC), act_dtype)
        tb = _pick_tb(R, Wp, in_row_bytes, per_buf_cap)
        grid = (pl.cdiv(R, tb),)
        # TODO(synk): on v7x, sweep pipeline_mode=pl.Buffered(3) on this activation spec.
        in_spec = pl.BlockSpec((tb, p, Wp * pC), lambda i: (i, 0, 0))
        w_spec = pl.BlockSpec((p, Wp * pC, Wp * n), lambda i: (0, 0, 0))
        b_spec = pl.BlockSpec((1, Wp * n), lambda i: (0, 0))
        out_shape = jax.ShapeDtypeStruct((R, Wp * n), out_dtype)
        out_spec = pl.BlockSpec((tb, Wp * n), lambda i: (i, 0))
        in_blk = _vmem_block_bytes((tb, p, Wp * pC), act_dtype)
        out_blk = _vmem_block_bytes((tb, Wp * n), out_dtype)
        mxu_rows = tb
    else:
        xr = x.reshape(R, p, Wp, pC)              # FREE row-major view
        w_k, b_k = w2, b2
        in_row_bytes = _vmem_block_bytes((1, p, Wp, pC), act_dtype)
        tb = _pick_tb(R, Wp, in_row_bytes, per_buf_cap)
        grid = (pl.cdiv(R, tb),)
        in_spec = pl.BlockSpec((tb, p, Wp, pC), lambda i: (i, 0, 0, 0))
        w_spec = pl.BlockSpec((p, pC, n), lambda i: (0, 0, 0))
        b_spec = pl.BlockSpec((1, n), lambda i: (0, 0))
        # Output written directly in NHWC memory order as a lane-dense 2-D slab.
        out_shape = jax.ShapeDtypeStruct((R * Wp, n), out_dtype)
        out_spec = pl.BlockSpec((tb * Wp, n), lambda i: (i, 0))
        in_blk = _vmem_block_bytes((tb, p, Wp, pC), act_dtype)
        out_blk = _vmem_block_bytes((tb * Wp, n), out_dtype)
        mxu_rows = tb * Wp

    # Keep double-buffered blocks + resident weight/bias under the scoped-VMEM limit,
    # and never below what a single step actually needs (huge-row edge case).
    w_bytes = (_vmem_block_bytes(w_k.shape, w_k.dtype)
               + _vmem_block_bytes(b_k.shape, b_k.dtype))
    need = 2 * in_blk + 2 * out_blk + 2 * w_bytes + (2 << 20)
    vmem_limit = min(max(vmem_limit, need), max(32 << 20, vmem_phys - (8 << 20)))

    # Advisory cost estimate so XLA schedules surrounding ops around the call.
    cost = pl.CostEstimate(
        flops=2 * grid[0] * p * mxu_rows * int(w_k.shape[1]) * int(w_k.shape[2]),
        transcendentals=0,
        bytes_accessed=(xr.size * jnp.dtype(act_dtype).itemsize
                        + w_k.size * jnp.dtype(w_k.dtype).itemsize
                        + b_k.size * jnp.dtype(b_k.dtype).itemsize
                        + R * Wp * n * jnp.dtype(out_dtype).itemsize),
    )

    kernel = functools.partial(
        _patch_conv_kernel, p=p, Wp=Wp, pC=pC, folded=folded,
        cast_dtype=None if compute_dtype is None else jnp.dtype(compute_dtype),
    )

    out = pl.pallas_call(
        kernel,
        out_shape=out_shape,
        grid_spec=pltpu.PrefetchScalarGridSpec(
            num_scalar_prefetch=0,
            grid=grid,
            in_specs=[in_spec, w_spec, b_spec],
            out_specs=out_spec,
        ),
        compiler_params=pltpu.CompilerParams(
            dimension_semantics=("parallel",),
            vmem_limit_bytes=int(vmem_limit),
        ),
        cost_estimate=cost,
    )(xr, w_k, b_k)

    return out.reshape(B, Hp, Wp, C_out)


def _reference(x, weight, bias, patch_size):
    """Pure-JAX reference of the same conv (for the correctness check)."""
    B, H, W, C = x.shape
    p = patch_size
    Hp, Wp = H // p, W // p
    x = x[:, :Hp * p, :Wp * p, :]
    patches = x.reshape(B, Hp, p, Wp, p, C).transpose(0, 1, 3, 2, 4, 5)
    patches = patches.reshape(B, Hp, Wp, p * p * C)
    w2 = weight.transpose(2, 3, 1, 0).reshape(p * p * C, -1)
    return jnp.einsum("bijk,kn->bijn", patches, w2) + bias


if __name__ == "__main__":
    key = jax.random.PRNGKey(0)

    def _check(B, H, W, C_in, C_out, patch, tol):
        kx, kw, kb = jax.random.split(jax.random.fold_in(key, C_out), 3)
        x = jax.random.normal(kx, (B, H, W, C_in), dtype=jnp.float32)
        weight = jax.random.normal(kw, (C_out, C_in, patch, patch), dtype=jnp.float32) * 0.1
        bias = jax.random.normal(kb, (C_out,), dtype=jnp.float32) * 0.1
        out = jax.block_until_ready(downsample2d(x, weight, bias, patch))
        ref = _reference(x, weight, bias, patch)
        assert out.shape == (B, H // patch, W // patch, C_out), out.shape
        # Tolerance accommodates MXU default-precision f32 matmul differences.
        assert jnp.allclose(out, ref, atol=tol, rtol=tol), f"mismatch (C_out={C_out})"

    # Small config consistent with the module (exercises the folded, lane-dense-output
    # path used when C_out < 128).
    _check(B=2, H=16, W=16, C_in=4, C_out=8, patch=2, tol=1e-2)
    # Wider-channel config (exercises the standard C_out >= 128 path: fully dense
    # (tb*Wp, C_out) stores in natural NHWC order).
    _check(B=2, H=16, W=16, C_in=16, C_out=128, patch=2, tol=1e-2)

    print("KERNEL_OK")
</pallas_src>

<mosaic_0001>
module attributes {stable_mosaic.version = 11 : i64} {
  func.func @_patch_conv_kernel(%arg0: i32, %arg1: memref<16x2x64xf32, #tpu.memory_space<vmem>>, %arg2: memref<2x64x64xf32, #tpu.memory_space<vmem>>, %arg3: memref<1x64xf32, #tpu.memory_space<vmem>>, %arg4: memref<16x64xf32, #tpu.memory_space<vmem>>) attributes {dimension_semantics = [#tpu.dimension_semantics<parallel>], iteration_bounds = array<i64: 1>, scalar_prefetch = 0 : i64, scratch_operands = 0 : i64, tpu.core_type = #tpu.core_type<tc>, window_params = [{transform_indices = @transform_0, window_bounds = array<i64: 16, 2, 64>}, {pipeline_mode = #tpu.pipeline_mode<synchronous>, transform_indices = @transform_1, window_bounds = array<i64: 2, 64, 64>}, {pipeline_mode = #tpu.pipeline_mode<synchronous>, transform_indices = @transform_2, window_bounds = array<i64: 1, 64>}, {transform_indices = @transform_3, window_bounds = array<i64: 16, 64>}]} {
    %c0 = arith.constant 0 : index
    %c0_0 = arith.constant 0 : index
    %c0_1 = arith.constant 0 : index
    %0 = vector.load %arg1[%c0, %c0_0, %c0_1] : memref<16x2x64xf32, #tpu.memory_space<vmem>>, vector<16x1x64xf32>
    %1 = vector.shape_cast %0 : vector<16x1x64xf32> to vector<16x64xf32>
    %c0_2 = arith.constant 0 : index
    %c0_3 = arith.constant 0 : index
    %c0_4 = arith.constant 0 : index
    %2 = vector.load %arg2[%c0_2, %c0_3, %c0_4] : memref<2x64x64xf32, #tpu.memory_space<vmem>>, vector<1x64x64xf32>
    %3 = vector.shape_cast %2 : vector<1x64x64xf32> to vector<64x64xf32>
    %cst = arith.constant dense<0.000000e+00> : vector<16x64xf32>
    %4 = tpu.matmul %1, %3, %cst {dimension_numbers = #tpu.dot_dimension_numbers<[1], [0], [0], [1], [0, 0, 1, 1], [], []>} : vector<16x64xf32>, vector<64x64xf32>, vector<16x64xf32> -> vector<16x64xf32>
    %c0_5 = arith.constant 0 : index
    %c1 = arith.constant 1 : index
    %c0_6 = arith.constant 0 : index
    %5 = vector.load %arg1[%c0_5, %c1, %c0_6] : memref<16x2x64xf32, #tpu.memory_space<vmem>>, vector<16x1x64xf32>
    %6 = vector.shape_cast %5 : vector<16x1x64xf32> to vector<16x64xf32>
    %c1_7 = arith.constant 1 : index
    %c0_8 = arith.constant 0 : index
    %c0_9 = arith.constant 0 : index
    %7 = vector.load %arg2[%c1_7, %c0_8, %c0_9] : memref<2x64x64xf32, #tpu.memory_space<vmem>>, vector<1x64x64xf32>
    %8 = vector.shape_cast %7 : vector<1x64x64xf32> to vector<64x64xf32>
    %cst_10 = arith.constant dense<0.000000e+00> : vector<16x64xf32>
    %9 = tpu.matmul %6, %8, %cst_10 {dimension_numbers = #tpu.dot_dimension_numbers<[1], [0], [0], [1], [0, 0, 1, 1], [], []>} : vector<16x64xf32>, vector<64x64xf32>, vector<16x64xf32> -> vector<16x64xf32>
    %10 = arith.addf %4, %9 : vector<16x64xf32>
    %c0_11 = arith.constant 0 : index
    %c0_12 = arith.constant 0 : index
    %11 = vector.load %arg3[%c0_11, %c0_12] : memref<1x64xf32, #tpu.memory_space<vmem>>, vector<1x64xf32>
    %12 = vector.broadcast %11 : vector<1x64xf32> to vector<16x64xf32>
    %13 = arith.addf %10, %12 : vector<16x64xf32>
    %c0_13 = arith.constant 0 : index
    %c0_14 = arith.constant 0 : index
    %14 = vector.load %arg4[%c0_13, %c0_14] : memref<16x64xf32, #tpu.memory_space<vmem>>, vector<16x64xf32>
    tpu.vector_store %arg4[%c0_13, %c0_14], %13 {strides = array<i32>} : memref<16x64xf32, #tpu.memory_space<vmem>>, vector<16x64xf32>,
    return
  }
  func.func @transform_0(%arg0: i32) -> (i32, i32, i32) {
    %c0_i32 = arith.constant 0 : i32
    %c0_i32_0 = arith.constant 0 : i32
    %c0_i32_1 = arith.constant 0 : i32
    return %arg0, %c0_i32, %c0_i32_0 : i32, i32, i32
  }
  func.func @transform_1(%arg0: i32) -> (i32, i32, i32) {
    %c0_i32 = arith.constant 0 : i32
    %c0_i32_0 = arith.constant 0 : i32
    %c0_i32_1 = arith.constant 0 : i32
    %c0_i32_2 = arith.constant 0 : i32
    return %c0_i32, %c0_i32_0, %c0_i32_1 : i32, i32, i32
  }
  func.func @transform_2(%arg0: i32) -> (i32, i32) {
    %c0_i32 = arith.constant 0 : i32
    %c0_i32_0 = arith.constant 0 : i32
    %c0_i32_1 = arith.constant 0 : i32
    return %c0_i32, %c0_i32_0 : i32, i32
  }
  func.func @transform_3(%arg0: i32) -> (i32, i32) {
    %c0_i32 = arith.constant 0 : i32
    %c0_i32_0 = arith.constant 0 : i32
    return %arg0, %c0_i32 : i32, i32
  }
}

</mosaic_0001>

<bundles_post_ra>
// kernel: tpu_custom_call.1
= control target key start
LH: loop header
LB: loop body
LE: loop exit
PB: predicated region body
PF: predicated region fallthrough
CT: control target
= control target key end

     0   :  { %8 = vsyncpa [#allocation3], 0  ;;  %s459_s0 = inlined_call_operand.hbm [shape: f32[16,2,64], index: 0, kind: input, shape index: {}]   ;;  %s460_s1 = inlined_call_operand.hbm [shape: f32[2,64,64], index: 1, kind: input, shape index: {}]   ;;  %s461_s2 = inlined_call_operand.vmem [shape: f32[1,64], index: 2, kind: input, shape index: {}]   ;;  %s462_s3 = inlined_call_operand.hbm [shape: f32[16,64], index: 3, kind: output, shape index: {}]  }
   0x1   :  { %9 = vsyncpa [#allocation6], 0 }
   0x2   :  { %10 = vsyncpa [#allocation4], 0  ;;  %s15_s14 = sshll.u32 %s459_s0, 4  ;;  %s380_s15 = smov [#allocation2]   ;;  %s16_s14 = int_to_ptr.hbm [resolvable:$true] %s15_s14 }
   0x3   :  { %s17_s16 = sshll.u32 %s380_s15, 4  ;;  %s28_s19 = sshll.u32 %s460_s1, 4  ;;  %s18_s16 = int_to_ptr.vmem [resolvable:$true] %s17_s16  ;;  %s29_s19 = int_to_ptr.hbm [resolvable:$true] %s28_s19 }
   0x4   :  { %s381_s20 = smov 32   ;;  %s382_s21 = smov 2  }
   0x5   :  { %23 = dma.hbm_to_vmem [thread:$0]  %s16_s14, 512, %s18_s16, [#allocation3], %s381_s20, %s381_s20, %s382_s21  }
   0x6   :  { %s383_s22 = smov [#allocation5]   ;;  %s384_s24 = smov 128  }
   0x7   :  { %s30_s23 = sshll.u32 %s383_s22, 4  ;;  %s385_s25 = smov 8   ;;  %s31_s23 = int_to_ptr.vmem [resolvable:$true] %s30_s23 }
   0x8   :  { %36 = dma.hbm_to_vmem [thread:$0]  %s29_s19, 2048, %s31_s23, [#allocation6], %s384_s24, %s384_s24, %s385_s25  }
   0x9   :  { %374 = dma.done.wait [#allocation3], 512  }
   0xa   :  { %375 = vsyncadd [#allocation3], 4294966784 }
   0xb   :  { %376 = dma.done.wait [#allocation6], 2048  }
   0xc   :  { %377 = vsyncadd [#allocation6], 4294965248  ;;  %v95_v0 = vld [vmem:[#allocation5 + $0x78] sm:$0xff]  ;;  %v94_v2 = vld [vmem:[#allocation5 + $0x70] sm:$0xff]  ;;  %vm113_vm0 = vcmask 1041409   ;;  %vm116_vm1 = vcmask 1042434  }
   0xd   :  { %v70_v1 = vld [vmem:[#allocation5 + $0x38] sm:$0xff]  ;;  %278 = vmatpush.msra.mxu2 %v95_v0  ;;  %v69_v3 = vld [vmem:[#allocation5 + $0x30] sm:$0xff]  ;;  %v93_v4 = vld [vmem:[#allocation5 + $0x68] sm:$0xff]  ;;  %160 = vmatpush.msra.mxu0 %v95_v0  ;;  %vm119_vm2 = vcmask 1043459   ;;  %vm122_vm3 = vcmask 1044484   ;;  %vm125_vm4 = vcmask 1045509  }
   0xe   :  { %286 = vmatpush.msra.mxu3 %v70_v1  ;;  %v68_v5 = vld [vmem:[#allocation5 + $0x28] sm:$0xff]  ;;  %231 = vmatpush.msra.mxu1 %v70_v1  ;;  %v92_v6 = vld [vmem:[#allocation5 + $0x60] sm:$0xff]  ;;  %v91_v8 = vld [vmem:[#allocation5 + $0x58] sm:$0xff]  ;;  %vm128_vm5 = vcmask 1046534   ;;  %vm131_vm6 = vcmask 1047559   ;;  %vm147_vm7 = vcmask 523264  }
   0xf   :  { %279 = vmatpush.msra.mxu2 %v94_v2  ;;  %v67_v7 = vld [vmem:[#allocation5 + $0x20] sm:$0xff]  ;;  %161 = vmatpush.msra.mxu0 %v94_v2  ;;  %v66_v9 = vld [vmem:[#allocation5 + $0x18] sm:$0xff]  ;;  %v79_v10 = vld [vmem:[#allocation2 + $0x11] sm:$0x1]  ;;  %s386_s26 = smov [#allocation7]   ;;  %s260_s30 = sshll.u32 %s462_s3, 4  ;;  %s261_s30 = int_to_ptr.hbm [resolvable:$true] %s260_s30 }
  0x10   :  { %287 = vmatpush.msra.mxu3 %v69_v3  ;;  %232 = vmatpush.msra.mxu1 %v69_v3  ;;  %v80_v11 = vld [vmem:[#allocation2 + $0x13] sm:$0x1]  ;;  %v81_v13 = vld [vmem:[#allocation2 + $0x15] sm:$0x1]  ;;  %v82_v14 = vld [vmem:[#allocation2 + $0x17] sm:$0x1] }
  0x11   :  { %280 = vmatpush.msra.mxu2 %v93_v4  ;;  %162 = vmatpush.msra.mxu0 %v93_v4  ;;  %v90_v12 = vld [vmem:[#allocation5 + $0x50] sm:$0xff]  ;;  %v83_v15 = vld [vmem:[#allocation2 + $0x19] sm:$0x1]  ;;  %v84_v16 = vld [vmem:[#allocation2 + $0x1b] sm:$0x1]  ;;  %v133_v22 = vrot.slane %v80_v11, 7 }
  0x12   :  { %288 = vmatpush.msra.mxu3 %v68_v5  ;;  %233 = vmatpush.msra.mxu1 %v68_v5  ;;  %v85_v17 = vld [vmem:[#allocation2 + $0x1d] sm:$0x1]  ;;  %v86_v18 = vld [vmem:[#allocation2 + $0x1f] sm:$0x1]  ;;  %v65_v19 = vld [vmem:[#allocation5 + $0x10] sm:$0xff]  ;;  %v135_v23 = vrot.slane %v81_v13, 6 }
  0x13   :  { %281 = vmatpush.msra.mxu2 %v92_v6  ;;  %163 = vmatpush.msra.mxu0 %v92_v6  ;;  %v89_v20 = vld [vmem:[#allocation5 + $0x48] sm:$0xff]  ;;  %v137_v24 = vrot.slane %v82_v14, 5  ;;  %v139_v25 = vrot.slane %v83_v15, 4  ;;  %v141_v26 = vrot.slane %v84_v16, 3  ;;  %v143_v27 = vrot.slane %v85_v17, 2  ;;  %v88_v31 = vld [vmem:[#allocation5 + $0x40] sm:$0xff] }
  0x14   :  { %289 = vmatpush.msra.mxu3 %v67_v7  ;;  %234 = vmatpush.msra.mxu1 %v67_v7  ;;  %v64_v21 = vld [vmem:[#allocation5 + $0x8] sm:$0xff]  ;;  %v145_v28 = vrot.slane %v86_v18, 1  ;;  %v55_v29 = vld [vmem:[#allocation2 + $0x10] sm:$0x1]  ;;  %v56_v30 = vld [vmem:[#allocation2 + $0x12] sm:$0x1]  ;;  %v134_v32 = vsel %vm113_vm0, %v133_v22, %v79_v10 }
  0x15   :  { %282 = vmatpush.msra.mxu2 %v91_v8  ;;  %164 = vmatpush.msra.mxu0 %v91_v8  ;;  %v57_v33 = vld [vmem:[#allocation2 + $0x14] sm:$0x1]  ;;  %v58_v34 = vld [vmem:[#allocation2 + $0x16] sm:$0x1]  ;;  %v59_v35 = vld [vmem:[#allocation2 + $0x18] sm:$0x1]  ;;  %v136_v36 = vsel %vm116_vm1, %v135_v23, %v134_v32 }
  0x16   :  { %290 = vmatpush.msra.mxu3 %v66_v9  ;;  %235 = vmatpush.msra.mxu1 %v66_v9  ;;  %v60_v37 = vld [vmem:[#allocation2 + $0x1a] sm:$0x1]  ;;  %v61_v38 = vld [vmem:[#allocation2 + $0x1c] sm:$0x1]  ;;  %v62_v39 = vld [vmem:[#allocation2 + $0x1e] sm:$0x1]  ;;  %v138_v41 = vsel %vm119_vm2, %v137_v24, %v136_v36 }
  0x17   :  { %283 = vmatpush.msra.mxu2 %v90_v12  ;;  %v63_v40 = vld [vmem:[#allocation5] sm:$0xff]  ;;  %v205_v42 = vrot.slane %v56_v30, 7  ;;  %v207_v43 = vrot.slane %v57_v33, 6  ;;  %v209_v44 = vrot.slane %v58_v34, 5  ;;  %165 = vmatpush.msra.mxu0 %v90_v12  ;;  %v140_v46 = vsel %vm122_vm3, %v139_v25, %v138_v41  ;;  %v75_v59 = vld [vmem:[#allocation2 + $0x9] sm:$0x1] }
  0x18   :  { %291 = vmatpush.msra.mxu3 %v65_v19  ;;  %236 = vmatpush.msra.mxu1 %v65_v19  ;;  %v71_v45 = vld [vmem:[#allocation2 + $0x1] sm:$0x1]  ;;  %v211_v47 = vrot.slane %v59_v35, 4  ;;  %v213_v48 = vrot.slane %v60_v37, 3  ;;  %v215_v49 = vrot.slane %v61_v38, 2  ;;  %v142_v51 = vsel %vm125_vm4, %v141_v26, %v140_v46  ;;  %s258_s27 = sshll.u32 %s386_s26, 4  ;;  %s259_s27 = int_to_ptr.vmem [resolvable:$true] %s258_s27 }
  0x19   :  { %284 = vmatpush.msra.mxu2 %v89_v20  ;;  %v72_v50 = vld [vmem:[#allocation2 + $0x3] sm:$0x1]  ;;  %v206_v52 = vsel %vm113_vm0, %v205_v42, %v55_v29  ;;  %v217_v53 = vrot.slane %v62_v39, 1  ;;  %166 = vmatpush.msra.mxu0 %v89_v20  ;;  %v73_v54 = vld [vmem:[#allocation2 + $0x5] sm:$0x1]  ;;  %v144_v57 = vsel %vm128_vm5, %v143_v27, %v142_v51  ;;  %v121_v5 = vrot.slane %v75_v59, 4 }
  0x1a   :  { %292 = vmatpush.msra.mxu3 %v64_v21  ;;  %237 = vmatpush.msra.mxu1 %v64_v21  ;;  %v74_v55 = vld [vmem:[#allocation2 + $0x7] sm:$0x1]  ;;  %v112_v56 = vrot.slane %v72_v50, 7  ;;  %v208_v58 = vsel %vm116_vm1, %v207_v43, %v206_v52  ;;  %v76_v60 = vld [vmem:[#allocation2 + $0xb] sm:$0x1]  ;;  %v146_v62 = vsel %vm131_vm6, %v145_v28, %v144_v57  ;;  %v115_v2 = vrot.slane %v73_v54, 6 }
  0x1b   :  { %285 = vmatpush.msra.mxu2 %v88_v31  ;;  %v77_v61 = vld [vmem:[#allocation2 + $0xd] sm:$0x1]  ;;  %v210_v63 = vsel %vm119_vm2, %v209_v44, %v208_v58  ;;  %167 = vmatpush.msra.mxu0 %v88_v31  ;;  %v78_v0 = vld [vmem:[#allocation2 + $0xf] sm:$0x1]  ;;  %v118_v4 = vrot.slane %v74_v55, 5  ;;  %v124_v6 = vrot.slane %v76_v60, 3 }
  0x1c   :  { %293 = vmatpush.msra.mxu3 %v63_v40  ;;  %238 = vmatpush.msra.mxu1 %v63_v40  ;;  %v114_v1 = vsel %vm113_vm0, %v112_v56, %v71_v45  ;;  %v212_v3 = vsel %vm122_vm3, %v211_v47, %v210_v63  ;;  %v47_v7 = vld [vmem:[#allocation2] sm:$0x1]  ;;  %v48_v8 = vld [vmem:[#allocation2 + $0x2] sm:$0x1]  ;;  %v127_v11 = vrot.slane %v77_v61, 2  ;;  %v130_v16 = vrot.slane %v78_v0, 1 }
  0x1d   :  { %275 = vmatmul.msk.f32.vlgmr.msra.gmra.mxu2 %vm147_vm7, %v146_v62  ;;  %v214_v9 = vsel %vm125_vm4, %v213_v48, %v212_v3  ;;  %v117_v10 = vsel %vm116_vm1, %v115_v2, %v114_v1  ;;  %v49_v12 = vld [vmem:[#allocation2 + $0x4] sm:$0x1]  ;;  %v50_v13 = vld [vmem:[#allocation2 + $0x6] sm:$0x1]  ;;  %v51_v17 = vld [vmem:[#allocation2 + $0x8] sm:$0x1] }
  0x1e   :  { %v216_v14 = vsel %vm128_vm5, %v215_v49, %v214_v9  ;;  %v120_v15 = vsel %vm119_vm2, %v118_v4, %v117_v10  ;;  %v52_v18 = vld [vmem:[#allocation2 + $0xa] sm:$0x1]  ;;  %v53_v21 = vld [vmem:[#allocation2 + $0xc] sm:$0x1]  ;;  %v191_v22 = vrot.slane %v48_v8, 7  ;;  %v193_v23 = vrot.slane %v49_v12, 6 }
  0x1f   :  { %v218_v19 = vsel %vm131_vm6, %v217_v53, %v216_v14  ;;  %v123_v20 = vsel %vm122_vm3, %v121_v5, %v120_v15  ;;  %v54_v25 = vld [vmem:[#allocation2 + $0xe] sm:$0x1]  ;;  %v195_v26 = vrot.slane %v50_v13, 5  ;;  %v197_v27 = vrot.slane %v51_v17, 4  ;;  %v301_v41 = vld [vmem:[%s461_s2] ss:$0 sm:$0xff] }
  0x20   :  { %277 = vmatmul.msk.f32.vlgmr.msra.gmra.mxu3 %vm147_vm7, %v218_v19  ;;  %v126_v24 = vsel %vm125_vm4, %v124_v6, %v123_v20  ;;  %v192_v29 = vsel %vm113_vm0, %v191_v22, %v47_v7  ;;  %v199_v30 = vrot.slane %v52_v18, 3  ;;  %v201_v33 = vrot.slane %v53_v21, 2 }
  0x21   :  { %v129_v28 = vsel %vm128_vm5, %v127_v11, %v126_v24  ;;  %v194_v32 = vsel %vm116_vm1, %v193_v23, %v192_v29  ;;  %v203_v35 = vrot.slane %v54_v25, 1 }
  0x22   :  { %v132_v31 = vsel %vm131_vm6, %v130_v16, %v129_v28  ;;  %v196_v34 = vsel %vm119_vm2, %v195_v26, %v194_v32 }
  0x23   :  { %274 = vmatmul.msk.f32.vlgmr.msra.gmra.mxu0 %vm147_vm7, %v132_v31  ;;  %v198_v36 = vsel %vm122_vm3, %v197_v27, %v196_v34 }
  0x24   :  { %v200_v37 = vsel %vm125_vm4, %v199_v30, %v198_v36 }
  0x25   :  { %v202_v38 = vsel %vm128_vm5, %v201_v33, %v200_v37 }
  0x26   :  { %v204_v39 = vsel %vm131_vm6, %v203_v35, %v202_v38 }
  0x27   :  { %276 = vmatmul.msk.f32.vlgmr.msra.gmra.mxu1 %vm147_vm7, %v204_v39 }
  0xa0   :  { %v172_v40 = vpop.f32.mrf.mxu2  ;;  %v169_v42 = vpop.f32.mrf.mxu0 }
  0xa3   :  { %v243_v43 = vpop.f32.mrf.mxu3 }
  0xa4   :  { %v244_v44 = vadd.f32 %v243_v43, %v172_v40  ;;  %v240_v45 = vpop.f32.mrf.mxu1 }
  0xa5   :  { %v241_v46 = vadd.f32 %v240_v45, %v169_v42 }
  0xa6   :  { %v251_v47 = vadd.f32 %v301_v41, %v244_v44 }
  0xa7   :  { %v250_v48 = vadd.f32 %v301_v41, %v241_v46 }
  0xa8   :  { %253 = vst.msk [vmem:[#allocation7 + $0x8] sm:$0xff] %vm147_vm7, %v251_v47 }
  0xa9   :  { %252 = vst.msk [vmem:[#allocation7] sm:$0xff] %vm147_vm7, %v250_v48 }
  0xaa   :  { %266 = dma.vmem_to_hbm [thread:$0]  %s259_s27, 256, %s261_s30, [#allocation4], %s384_s24, %s384_s24, %s385_s25  }
  0xab   :  { %378 = dma.done.wait [#allocation4], 256  }
  0xac   :  { %379 = vsyncadd [#allocation4], 4294967040 }
  0xad   :  { %271 = vsyncpa [#allocation3], 1 }
  0xae   :  { %272 = vsyncpa [#allocation6], 1 }
  0xaf   :  { %273 = vsyncpa [#allocation4], 1 }

</bundles_post_ra>
